<compile_context>
chip_gen: v6e
topology: v6e:2x2x1
jax: 0.10.0
libtpu: 0.0.40
codegen_flags: <defaults>
</compile_context>

<pallas_src>
import functools

import jax
import jax.numpy as jnp
from jax.experimental import pallas as pl
from jax.experimental.pallas import tpu as pltpu

EPS = 1e-5


# ----------------------------- Pallas kernel -----------------------------

def _double_conv_kernel(x_ref, w1_ref, w2_ref, bn1_ref, bn2_ref, emb_ref, wemb_ref,
                        out_ref, *, width, cmid, cout, inv_count):
    N, H, _ = x_ref.shape
    WCm = width * cmid             # W * mid_channels  (lane-dense)
    WCo = width * cout             # W * out_channels  (lane-dense)

    def conv_rows(v3, w_cat):
        # v3: (N, H, W*C) bf16.  3x3 SAME conv as ONE MXU matmul:
        #  - kh taps = row shifts (zero rows at the H boundary),
        #  - kw taps + W-boundary padding live inside the banded weight w_cat.
        n, h, wc = v3.shape
        z = jnp.zeros((n, 1, wc), jnp.bfloat16)
        up = jnp.concatenate([z, v3[:, :h - 1, :]], axis=1)   # row i sees row i-1 (kh=0)
        dn = jnp.concatenate([v3[:, 1:, :], z], axis=1)       # row i sees row i+1 (kh=2)
        cat = jnp.concatenate([up, v3, dn], axis=2).reshape(n * h, 3 * wc)
        return jnp.dot(cat, w_cat, preferred_element_type=jnp.float32)

    def channel_sum_tiled(rows, channels):
        # Per-channel sum across the W positions of the lane dim, result tiled back
        # across W.  log2(W) XLU lane rotations; requires W to be a power of two.
        out = rows
        shift = channels
        reps = width
        while reps > 1:
            out = out + pltpu.roll(out, shift=shift, axis=1)
            shift *= 2
            reps //= 2
        return out

    def batchnorm_relu(acc, channels, gamma, beta):
        # Single-pass batch stats (strictly f32); BN affine folded into scale/shift so
        # the per-element epilogue on the (N*H, W*C) block is one mul + one add + max.
        stats = jnp.concatenate(
            [jnp.sum(acc, axis=0, keepdims=True),
             jnp.sum(acc * acc, axis=0, keepdims=True)], axis=0)      # (2, W*C) f32
        totals = channel_sum_tiled(stats, channels) * inv_count
        mu = totals[0:1, :]
        var = totals[1:2, :] - mu * mu
        scale = gamma * jax.lax.rsqrt(var + EPS)                       # per-channel row
        shift = beta - mu * scale
        return jnp.maximum(acc * scale + shift, 0.0)

    bn1 = bn1_ref[...]             # rows: [conv1 bias, gamma1, beta1]   (tiled across W)
    bn2 = bn2_ref[...]             # rows: [conv2 bias, gamma2, beta2, emb bias]

    # ---- conv1 + BN1 + ReLU ----
    acc1 = conv_rows(x_ref[...], w1_ref[...]) + bn1[0:1, :]            # (N*H, W*Cmid) f32
    h1 = batchnorm_relu(acc1, cmid, bn1[1:2, :], bn1[2:3, :])

    # ---- conv2 + BN2 + ReLU (cast to bf16 once, before the im2col concat) ----
    acc2 = conv_rows(h1.astype(jnp.bfloat16).reshape(N, H, WCm),
                     w2_ref[...]) + bn2[0:1, :]                        # (N*H, W*Cout) f32
    h2 = batchnorm_relu(acc2, cout, bn2[1:2, :], bn2[2:3, :])

    # ---- fused time + class embedding: SiLU (f32, EUP) -> single bf16 matmul ----
    e = emb_ref[...]
    e = e * (1.0 / (1.0 + jnp.exp(-e)))                                # SiLU in f32
    eo = jnp.dot(e.astype(jnp.bfloat16), wemb_ref[...],
                 preferred_element_type=jnp.float32) + bn2[3:4, :]

    out_ref[...] = (h2.reshape(N, H, WCo) + eo[:, None, :]).astype(out_ref.dtype)


# ----------------------------- wrapper / weight plumbing -----------------------------

def _band_weights(w, width):
    """HWIO (3,3,Ci,Co) -> banded (3*width*Ci, width*Co).

    out[(kh*width + src)*Ci + ci, j*Co + co] = w[kh, src - j + 1, ci, co] when |src-j|<=1,
    else 0 — i.e. the kw taps and SAME zero-padding along W are folded into the weight.
    """
    kh_, kw_, ci_, co_ = w.shape
    src = jnp.arange(width)[:, None, None]
    j = jnp.arange(width)[None, :, None]
    k = jnp.arange(kw_)[None, None, :]
    sel = (k == (src - j + 1)).astype(w.dtype)            # (W, W, KW)
    band = jnp.einsum("sjk,hkio->hsijo", sel, w)          # (KH, W, Ci, W, Co)
    return band.reshape(kh_ * width * ci_, width * co_)


def double_conv_forward(x_nchw, params, time_emb, class_emb):
    N, Cin, H, W = x_nchw.shape
    Cmid = params["w1"].shape[-1]
    Cout = params["w2"].shape[-1]
    assert (W & (W - 1)) == 0, "lane-roll BatchNorm pooling requires W to be a power of two"

    # NCHW -> lane-dense (N, H, W*Cin), shipped as bf16 (MXU operand dtype).
    # TODO(synk): at production sizes keep activations lane-dense between layers instead
    # of paying an HBM transpose before/after every DoubleConv.
    x3 = jnp.transpose(x_nchw, (0, 2, 3, 1)).reshape(N, H, W * Cin).astype(jnp.bfloat16)

    # conv weights -> banded matrices, bf16 MXU operands.
    # TODO(synk): w1b/w2b are ~90% structural zeros; before scaling W up, band over a
    # W-tile with a 1-column halo grid, or build the band in VMEM from the compact
    # (3,3,Ci,Co) weights with iota masks instead of DMA-ing the full band.
    w1b = _band_weights(params["w1"].astype(jnp.float32), W).astype(jnp.bfloat16)
    w2b = _band_weights(params["w2"].astype(jnp.float32), W).astype(jnp.bfloat16)

    # pack the tiny per-channel params (tiled across W) into two f32 operands
    tile = lambda v: jnp.tile(v.reshape(-1).astype(jnp.float32), W)
    bn1 = jnp.stack([tile(params["b1"]), tile(params["g1"]), tile(params["be1"])])
    bn2 = jnp.stack([tile(params["b2"]), tile(params["g2"]), tile(params["be2"]),
                     tile(params["bt"] + params["bc"])])

    # fused time/class embedding: concat inputs, stack + W-tile the linear weights (bf16)
    emb = jnp.concatenate([time_emb, class_emb], axis=1).astype(jnp.float32)
    wemb = jnp.tile(jnp.concatenate([params["wt"], params["wc"]], axis=0).astype(jnp.float32),
                    (1, W)).astype(jnp.bfloat16)

    vmem = pl.BlockSpec(memory_space=pltpu.MemorySpace.VMEM)
    kernel = functools.partial(_double_conv_kernel, width=W, cmid=Cmid, cout=Cout,
                               inv_count=1.0 / float(N * H * W))
    out = pl.pallas_call(
        kernel,
        out_shape=jax.ShapeDtypeStruct((N, H, W * Cout), jnp.float32),   # lane-dense output
        in_specs=[vmem] * 7,
        out_specs=vmem,
        # TODO(synk): production / v7x: halo-tiled "parallel" grid over N or H row blocks
        # + two-phase BatchNorm; set vmem_limit_bytes from the actual tile footprint.
    )(x3, w1b, w2b, bn1, bn2, emb, wemb)

    return jnp.transpose(out.reshape(N, H, W, Cout), (0, 3, 1, 2))       # back to NCHW


# ----------------------------- pure-JAX reference -----------------------------

def ref_forward(x_nchw, params, temb, cemb, mxu_dtype=jnp.float32):
    """PyTorch-semantics reference; mxu_dtype=bfloat16 mirrors the kernel's MXU policy."""
    x = jnp.transpose(x_nchw, (0, 2, 3, 1)).astype(jnp.float32)

    def conv(v, w, b):
        y = jax.lax.conv_general_dilated(
            v.astype(mxu_dtype), w.astype(mxu_dtype), (1, 1), "SAME",
            dimension_numbers=("NHWC", "HWIO", "NHWC"),
            preferred_element_type=jnp.float32)
        return y + b.reshape(1, 1, 1, -1)

    def bn(v, g, be):
        mu = jnp.mean(v, axis=(0, 1, 2), keepdims=True)
        var = jnp.mean((v - mu) ** 2, axis=(0, 1, 2), keepdims=True)
        return (v - mu) * jax.lax.rsqrt(var + EPS) * g.reshape(1, 1, 1, -1) \
            + be.reshape(1, 1, 1, -1)

    h = jnp.maximum(bn(conv(x, params["w1"], params["b1"]), params["g1"], params["be1"]), 0.0)
    h = jnp.maximum(bn(conv(h, params["w2"], params["b2"]), params["g2"], params["be2"]), 0.0)

    silu = lambda v: v * jax.nn.sigmoid(v)
    lin = lambda v, w, b: jnp.dot(silu(v).astype(mxu_dtype), w.astype(mxu_dtype),
                                  preferred_element_type=jnp.float32) + b
    te = lin(temb, params["wt"], params["bt"])
    ce = lin(cemb, params["wc"], params["bc"])
    h = h + te[:, None, None, :] + ce[:, None, None, :]
    return jnp.transpose(h, (0, 3, 1, 2))


def init_params(key, in_c, mid_c, out_c, t_dim, c_dim):
    ks = jax.random.split(key, 8)
    s = 0.1
    return {
        "w1": s * jax.random.normal(ks[0], (3, 3, in_c, mid_c), jnp.float32),
        "b1": s * jax.random.normal(ks[1], (1, mid_c), jnp.float32),
        "g1": jnp.ones((1, mid_c), jnp.float32),
        "be1": jnp.zeros((1, mid_c), jnp.float32),
        "w2": s * jax.random.normal(ks[2], (3, 3, mid_c, out_c), jnp.float32),
        "b2": s * jax.random.normal(ks[3], (1, out_c), jnp.float32),
        "g2": jnp.ones((1, out_c), jnp.float32),
        "be2": jnp.zeros((1, out_c), jnp.float32),
        "wt": s * jax.random.normal(ks[4], (t_dim, out_c), jnp.float32),
        "bt": s * jax.random.normal(ks[5], (1, out_c), jnp.float32),
        "wc": s * jax.random.normal(ks[6], (c_dim, out_c), jnp.float32),
        "bc": s * jax.random.normal(ks[7], (1, out_c), jnp.float32),
    }


if __name__ == "__main__":
    N, Cin, H, W = 2, 4, 16, 16
    Cmid = Cout = 8               # mid_channels defaults to out_channels
    Tdim, Cdim = 16, 16

    key = jax.random.PRNGKey(0)
    kx, kt, kc, kp = jax.random.split(key, 4)
    x = jax.random.normal(kx, (N, Cin, H, W), jnp.float32)        # NCHW like PyTorch
    time_emb = jax.random.normal(kt, (N, Tdim), jnp.float32)
    class_emb = jax.random.normal(kc, (N, Cdim), jnp.float32)
    params = init_params(kp, Cin, Cmid, Cout, Tdim, Cdim)

    out = jax.block_until_ready(double_conv_forward(x, params, time_emb, class_emb))
    assert out.shape == (N, Cout, H, W), out.shape

    # logic check: reference using the same bf16-MXU-operand policy (tight tolerance)
    ref_bf16 = jax.block_until_ready(
        ref_forward(x, params, time_emb, class_emb, mxu_dtype=jnp.bfloat16))
    assert jnp.allclose(out, ref_bf16, rtol=1e-2, atol=1e-2), \
        float(jnp.max(jnp.abs(out - ref_bf16)))

    # drift check vs the full-f32 PyTorch-semantics reference (bf16 MXU inputs => looser)
    ref_f32 = jax.block_until_ready(ref_forward(x, params, time_emb, class_emb))
    assert jnp.allclose(out, ref_f32, rtol=5e-2, atol=5e-2), \
        float(jnp.max(jnp.abs(out - ref_f32)))

    print("KERNEL_OK")
</pallas_src>

<mosaic_0001>
module attributes {stable_mosaic.version = 11 : i64} {
  func.func @_double_conv_kernel(%arg0: memref<2x16x64xbf16, #tpu.memory_space<vmem>>, %arg1: memref<192x128xbf16, #tpu.memory_space<vmem>>, %arg2: memref<384x128xbf16, #tpu.memory_space<vmem>>, %arg3: memref<3x128xf32, #tpu.memory_space<vmem>>, %arg4: memref<4x128xf32, #tpu.memory_space<vmem>>, %arg5: memref<2x32xf32, #tpu.memory_space<vmem>>, %arg6: memref<32x128xbf16, #tpu.memory_space<vmem>>, %arg7: memref<2x16x128xf32, #tpu.memory_space<vmem>>) attributes {dimension_semantics = [], scalar_prefetch = 0 : i64, scratch_operands = 0 : i64, tpu.core_type = #tpu.core_type<tc>} {
    %c0 = arith.constant 0 : index
    %c0_0 = arith.constant 0 : index
    %0 = vector.load %arg3[%c0, %c0_0] : memref<3x128xf32, #tpu.memory_space<vmem>>, vector<3x128xf32>
    %c0_1 = arith.constant 0 : index
    %c0_2 = arith.constant 0 : index
    %1 = vector.load %arg4[%c0_1, %c0_2] : memref<4x128xf32, #tpu.memory_space<vmem>>, vector<4x128xf32>
    %c0_3 = arith.constant 0 : index
    %c0_4 = arith.constant 0 : index
    %c0_5 = arith.constant 0 : index
    %2 = vector.load %arg0[%c0_3, %c0_4, %c0_5] : memref<2x16x64xbf16, #tpu.memory_space<vmem>>, vector<2x16x64xbf16>
    %c0_6 = arith.constant 0 : index
    %c0_7 = arith.constant 0 : index
    %3 = vector.load %arg1[%c0_6, %c0_7] : memref<192x128xbf16, #tpu.memory_space<vmem>>, vector<192x128xbf16>
    %cst = arith.constant 0.000000e+00 : bf16
    %4 = vector.broadcast %cst : bf16 to vector<2x1x64xbf16>
    %5 = vector.extract_strided_slice %2 {offsets = [0, 0, 0], sizes = [2, 15, 64], strides = [1, 1, 1]} : vector<2x16x64xbf16> to vector<2x15x64xbf16>
    %6 = tpu.concatenate %4, %5 in 1 : vector<2x1x64xbf16>, vector<2x15x64xbf16> -> vector<2x16x64xbf16>
    %7 = vector.extract_strided_slice %2 {offsets = [0, 1, 0], sizes = [2, 15, 64], strides = [1, 1, 1]} : vector<2x16x64xbf16> to vector<2x15x64xbf16>
    %8 = tpu.concatenate %7, %4 in 1 : vector<2x15x64xbf16>, vector<2x1x64xbf16> -> vector<2x16x64xbf16>
    %9 = tpu.concatenate %6, %2, %8 in 2 : vector<2x16x64xbf16>, vector<2x16x64xbf16>, vector<2x16x64xbf16> -> vector<2x16x192xbf16>
    %10 = vector.shape_cast %9 : vector<2x16x192xbf16> to vector<32x192xbf16>
    %cst_8 = arith.constant dense<0.000000e+00> : vector<32x128xf32>
    %11 = tpu.matmul %10, %3, %cst_8 {dimension_numbers = #tpu.dot_dimension_numbers<[1], [0], [0], [1], [0, 0, 1, 1], [], []>} : vector<32x192xbf16>, vector<192x128xbf16>, vector<32x128xf32> -> vector<32x128xf32>
    %12 = vector.extract_strided_slice %0 {offsets = [0, 0], sizes = [1, 128], strides = [1, 1]} : vector<3x128xf32> to vector<1x128xf32>
    %13 = vector.broadcast %12 : vector<1x128xf32> to vector<32x128xf32>
    %14 = arith.addf %11, %13 : vector<32x128xf32>
    %15 = vector.extract_strided_slice %0 {offsets = [1, 0], sizes = [1, 128], strides = [1, 1]} : vector<3x128xf32> to vector<1x128xf32>
    %16 = vector.extract_strided_slice %0 {offsets = [2, 0], sizes = [1, 128], strides = [1, 1]} : vector<3x128xf32> to vector<1x128xf32>
    %cst_9 = arith.constant dense<0.000000e+00> : vector<128xf32>
    %17 = vector.multi_reduction <add>, %14, %cst_9 [0] : vector<32x128xf32> to vector<128xf32>
    %18 = vector.shape_cast %17 : vector<128xf32> to vector<1x128xf32>
    %19 = arith.mulf %14, %14 : vector<32x128xf32>
    %cst_10 = arith.constant dense<0.000000e+00> : vector<128xf32>
    %20 = vector.multi_reduction <add>, %19, %cst_10 [0] : vector<32x128xf32> to vector<128xf32>
    %21 = vector.shape_cast %20 : vector<128xf32> to vector<1x128xf32>
    %22 = tpu.concatenate %18, %21 in 0 : vector<1x128xf32>, vector<1x128xf32> -> vector<2x128xf32>
    %c8_i32 = arith.constant 8 : i32
    %23 = tpu.dynamic_rotate %22 by %c8_i32 dim 1 : vector<2x128xf32>, i32 -> vector<2x128xf32>
    %24 = arith.addf %22, %23 : vector<2x128xf32>
    %c16_i32 = arith.constant 16 : i32
    %25 = tpu.dynamic_rotate %24 by %c16_i32 dim 1 : vector<2x128xf32>, i32 -> vector<2x128xf32>
    %26 = arith.addf %24, %25 : vector<2x128xf32>
    %c32_i32 = arith.constant 32 : i32
    %27 = tpu.dynamic_rotate %26 by %c32_i32 dim 1 : vector<2x128xf32>, i32 -> vector<2x128xf32>
    %28 = arith.addf %26, %27 : vector<2x128xf32>
    %c64_i32 = arith.constant 64 : i32
    %29 = tpu.dynamic_rotate %28 by %c64_i32 dim 1 : vector<2x128xf32>, i32 -> vector<2x128xf32>
    %30 = arith.addf %28, %29 : vector<2x128xf32>
    %cst_11 = arith.constant 0.001953125 : f32
    %31 = vector.broadcast %cst_11 : f32 to vector<2x128xf32>
    %32 = arith.mulf %30, %31 : vector<2x128xf32>
    %33 = vector.extract_strided_slice %32 {offsets = [0, 0], sizes = [1, 128], strides = [1, 1]} : vector<2x128xf32> to vector<1x128xf32>
    %34 = vector.extract_strided_slice %32 {offsets = [1, 0], sizes = [1, 128], strides = [1, 1]} : vector<2x128xf32> to vector<1x128xf32>
    %35 = arith.mulf %33, %33 : vector<1x128xf32>
    %36 = arith.subf %34, %35 : vector<1x128xf32>
    %cst_12 = arith.constant 9.99999974E-6 : f32
    %37 = vector.broadcast %cst_12 : f32 to vector<1x128xf32>
    %38 = arith.addf %36, %37 : vector<1x128xf32>
    %39 = math.rsqrt %38 : vector<1x128xf32>
    %40 = arith.mulf %15, %39 : vector<1x128xf32>
    %41 = arith.mulf %33, %40 : vector<1x128xf32>
    %42 = arith.subf %16, %41 : vector<1x128xf32>
    %43 = vector.broadcast %40 : vector<1x128xf32> to vector<32x128xf32>
    %44 = arith.mulf %14, %43 : vector<32x128xf32>
    %45 = vector.broadcast %42 : vector<1x128xf32> to vector<32x128xf32>
    %46 = arith.addf %44, %45 : vector<32x128xf32>
    %cst_13 = arith.constant 0.000000e+00 : f32
    %47 = vector.broadcast %cst_13 : f32 to vector<32x128xf32>
    %48 = arith.maximumf %46, %47 : vector<32x128xf32>
    %49 = arith.truncf %48 : vector<32x128xf32> to vector<32x128xbf16>
    %50 = vector.shape_cast %49 : vector<32x128xbf16> to vector<2x16x128xbf16>
    %c0_14 = arith.constant 0 : index
    %c0_15 = arith.constant 0 : index
    %51 = vector.load %arg2[%c0_14, %c0_15] : memref<384x128xbf16, #tpu.memory_space<vmem>>, vector<384x128xbf16>
    %cst_16 = arith.constant 0.000000e+00 : bf16
    %52 = vector.broadcast %cst_16 : bf16 to vector<2x1x128xbf16>
    %53 = vector.extract_strided_slice %50 {offsets = [0, 0, 0], sizes = [2, 15, 128], strides = [1, 1, 1]} : vector<2x16x128xbf16> to vector<2x15x128xbf16>
    %54 = tpu.concatenate %52, %53 in 1 : vector<2x1x128xbf16>, vector<2x15x128xbf16> -> vector<2x16x128xbf16>
    %55 = vector.extract_strided_slice %50 {offsets = [0, 1, 0], sizes = [2, 15, 128], strides = [1, 1, 1]} : vector<2x16x128xbf16> to vector<2x15x128xbf16>
    %56 = tpu.concatenate %55, %52 in 1 : vector<2x15x128xbf16>, vector<2x1x128xbf16> -> vector<2x16x128xbf16>
    %57 = tpu.concatenate %54, %50, %56 in 2 : vector<2x16x128xbf16>, vector<2x16x128xbf16>, vector<2x16x128xbf16> -> vector<2x16x384xbf16>
    %58 = vector.shape_cast %57 : vector<2x16x384xbf16> to vector<32x384xbf16>
    %cst_17 = arith.constant dense<0.000000e+00> : vector<32x128xf32>
    %59 = tpu.matmul %58, %51, %cst_17 {dimension_numbers = #tpu.dot_dimension_numbers<[1], [0], [0], [1], [0, 0, 1, 1], [], []>} : vector<32x384xbf16>, vector<384x128xbf16>, vector<32x128xf32> -> vector<32x128xf32>
    %60 = vector.extract_strided_slice %1 {offsets = [0, 0], sizes = [1, 128], strides = [1, 1]} : vector<4x128xf32> to vector<1x128xf32>
    %61 = vector.broadcast %60 : vector<1x128xf32> to vector<32x128xf32>
    %62 = arith.addf %59, %61 : vector<32x128xf32>
    %63 = vector.extract_strided_slice %1 {offsets = [1, 0], sizes = [1, 128], strides = [1, 1]} : vector<4x128xf32> to vector<1x128xf32>
    %64 = vector.extract_strided_slice %1 {offsets = [2, 0], sizes = [1, 128], strides = [1, 1]} : vector<4x128xf32> to vector<1x128xf32>
    %cst_18 = arith.constant dense<0.000000e+00> : vector<128xf32>
    %65 = vector.multi_reduction <add>, %62, %cst_18 [0] : vector<32x128xf32> to vector<128xf32>
    %66 = vector.shape_cast %65 : vector<128xf32> to vector<1x128xf32>
    %67 = arith.mulf %62, %62 : vector<32x128xf32>
    %cst_19 = arith.constant dense<0.000000e+00> : vector<128xf32>
    %68 = vector.multi_reduction <add>, %67, %cst_19 [0] : vector<32x128xf32> to vector<128xf32>
    %69 = vector.shape_cast %68 : vector<128xf32> to vector<1x128xf32>
    %70 = tpu.concatenate %66, %69 in 0 : vector<1x128xf32>, vector<1x128xf32> -> vector<2x128xf32>
    %c8_i32_20 = arith.constant 8 : i32
    %71 = tpu.dynamic_rotate %70 by %c8_i32_20 dim 1 : vector<2x128xf32>, i32 -> vector<2x128xf32>
    %72 = arith.addf %70, %71 : vector<2x128xf32>
    %c16_i32_21 = arith.constant 16 : i32
    %73 = tpu.dynamic_rotate %72 by %c16_i32_21 dim 1 : vector<2x128xf32>, i32 -> vector<2x128xf32>
    %74 = arith.addf %72, %73 : vector<2x128xf32>
    %c32_i32_22 = arith.constant 32 : i32
    %75 = tpu.dynamic_rotate %74 by %c32_i32_22 dim 1 : vector<2x128xf32>, i32 -> vector<2x128xf32>
    %76 = arith.addf %74, %75 : vector<2x128xf32>
    %c64_i32_23 = arith.constant 64 : i32
    %77 = tpu.dynamic_rotate %76 by %c64_i32_23 dim 1 : vector<2x128xf32>, i32 -> vector<2x128xf32>
    %78 = arith.addf %76, %77 : vector<2x128xf32>
    %cst_24 = arith.constant 0.001953125 : f32
    %79 = vector.broadcast %cst_24 : f32 to vector<2x128xf32>
    %80 = arith.mulf %78, %79 : vector<2x128xf32>
    %81 = vector.extract_strided_slice %80 {offsets = [0, 0], sizes = [1, 128], strides = [1, 1]} : vector<2x128xf32> to vector<1x128xf32>
    %82 = vector.extract_strided_slice %80 {offsets = [1, 0], sizes = [1, 128], strides = [1, 1]} : vector<2x128xf32> to vector<1x128xf32>
    %83 = arith.mulf %81, %81 : vector<1x128xf32>
    %84 = arith.subf %82, %83 : vector<1x128xf32>
    %cst_25 = arith.constant 9.99999974E-6 : f32
    %85 = vector.broadcast %cst_25 : f32 to vector<1x128xf32>
    %86 = arith.addf %84, %85 : vector<1x128xf32>
    %87 = math.rsqrt %86 : vector<1x128xf32>
    %88 = arith.mulf %63, %87 : vector<1x128xf32>
    %89 = arith.mulf %81, %88 : vector<1x128xf32>
    %90 = arith.subf %64, %89 : vector<1x128xf32>
    %91 = vector.broadcast %88 : vector<1x128xf32> to vector<32x128xf32>
    %92 = arith.mulf %62, %91 : vector<32x128xf32>
    %93 = vector.broadcast %90 : vector<1x128xf32> to vector<32x128xf32>
    %94 = arith.addf %92, %93 : vector<32x128xf32>
    %cst_26 = arith.constant 0.000000e+00 : f32
    %95 = vector.broadcast %cst_26 : f32 to vector<32x128xf32>
    %96 = arith.maximumf %94, %95 : vector<32x128xf32>
    %c0_27 = arith.constant 0 : index
    %c0_28 = arith.constant 0 : index
    %97 = vector.load %arg5[%c0_27, %c0_28] : memref<2x32xf32, #tpu.memory_space<vmem>>, vector<2x32xf32>
    %cst_29 = arith.constant 0.000000e+00 : f32
    %98 = vector.broadcast %cst_29 : f32 to vector<2x32xf32>
    %99 = arith.subf %98, %97 : vector<2x32xf32>
    %100 = math.exp %99 : vector<2x32xf32>
    %cst_30 = arith.constant 1.000000e+00 : f32
    %101 = vector.broadcast %cst_30 : f32 to vector<2x32xf32>
    %102 = arith.addf %101, %100 : vector<2x32xf32>
    %cst_31 = arith.constant 1.000000e+00 : f32
    %103 = vector.broadcast %cst_31 : f32 to vector<2x32xf32>
    %104 = arith.divf %103, %102 : vector<2x32xf32>
    %105 = arith.mulf %97, %104 : vector<2x32xf32>
    %106 = arith.truncf %105 : vector<2x32xf32> to vector<2x32xbf16>
    %c0_32 = arith.constant 0 : index
    %c0_33 = arith.constant 0 : index
    %107 = vector.load %arg6[%c0_32, %c0_33] : memref<32x128xbf16, #tpu.memory_space<vmem>>, vector<32x128xbf16>
    %cst_34 = arith.constant dense<0.000000e+00> : vector<2x128xf32>
    %108 = tpu.matmul %106, %107, %cst_34 {dimension_numbers = #tpu.dot_dimension_numbers<[1], [0], [0], [1], [0, 0, 1, 1], [], []>} : vector<2x32xbf16>, vector<32x128xbf16>, vector<2x128xf32> -> vector<2x128xf32>
    %109 = vector.extract_strided_slice %1 {offsets = [3, 0], sizes = [1, 128], strides = [1, 1]} : vector<4x128xf32> to vector<1x128xf32>
    %110 = vector.broadcast %109 : vector<1x128xf32> to vector<2x128xf32>
    %111 = arith.addf %108, %110 : vector<2x128xf32>
    %112 = vector.shape_cast %96 : vector<32x128xf32> to vector<2x16x128xf32>
    %113 = vector.shape_cast %111 : vector<2x128xf32> to vector<2x1x128xf32>
    %114 = vector.broadcast %113 : vector<2x1x128xf32> to vector<2x16x128xf32>
    %115 = arith.addf %112, %114 : vector<2x16x128xf32>
    %c0_35 = arith.constant 0 : index
    %c0_36 = arith.constant 0 : index
    %c0_37 = arith.constant 0 : index
    %116 = vector.load %arg7[%c0_35, %c0_36, %c0_37] : memref<2x16x128xf32, #tpu.memory_space<vmem>>, vector<2x16x128xf32>
    tpu.vector_store %arg7[%c0_35, %c0_36, %c0_37], %115 {strides = array<i32>} : memref<2x16x128xf32, #tpu.memory_space<vmem>>, vector<2x16x128xf32>,
    return
  }
}

</mosaic_0001>

<bundles_post_ra>
// kernel: tpu_custom_call.1
= control target key start
LH: loop header
LB: loop body
LE: loop exit
PB: predicated region body
PF: predicated region fallthrough
CT: control target
= control target key end

     0   :  { %12 = vsyncpa [#allocation3], 0  ;;  %s1428_s0 = inlined_call_operand.hbm [shape: bf16[2,16,64], index: 0, kind: input, shape index: {}]   ;;  %s1429_s1 = inlined_call_operand.hbm [shape: bf16[192,128], index: 1, kind: input, shape index: {}]   ;;  %s1430_s2 = inlined_call_operand.hbm [shape: bf16[384,128], index: 2, kind: input, shape index: {}]   ;;  %s1431_s3 = inlined_call_operand.vmem [shape: f32[3,128], index: 3, kind: input, shape index: {}]   ;;  %s1432_s4 = inlined_call_operand.hbm [shape: f32[4,128], index: 4, kind: input, shape index: {}]   ;;  %s1433_s5 = inlined_call_operand.vmem [shape: f32[2,32], index: 5, kind: input, shape index: {}]   ;;  %s1434_s6 = inlined_call_operand.hbm [shape: bf16[32,128], index: 6, kind: input, shape index: {}]   ;;  %s1435_s7 = inlined_call_operand.hbm [shape: f32[2,16,128], index: 7, kind: output, shape index: {}]  }
   0x1   :  { %13 = vsyncpa [#allocation6], 0 }
   0x2   :  { %14 = vsyncpa [#allocation9], 0 }
   0x3   :  { %15 = vsyncpa [#allocation4], 0  ;;  %s1214_s24 = smov [#allocation5]   ;;  %s1215_s26 = smov [#allocation8]  }
   0x4   :  { %s33_s25 = sshll.u32 %s1214_s24, 4  ;;  %s60_s27 = sshll.u32 %s1215_s26, 4  ;;  %s34_s25 = int_to_ptr.vmem [resolvable:$true] %s33_s25  ;;  %s61_s27 = int_to_ptr.vmem [resolvable:$true] %s60_s27 }
   0x5   :  { %s1094_s28 = scalar_lea.vmem %s34_s25, 1536  ;;  %p1099_p1 = scmp.lt.s32.totalorder %s34_s25, %s34_s25 }
   0x6   :  { %p1095_p0 = scmp.ne.s32.totalorder %s34_s25, %s1094_s28  ;;  %p1100_p2 = scmp.lt.s32.totalorder %s1094_s28, %s1094_s28 }
   0x8   :  { %p1101_p3 = por %p1100_p2, %p1099_p1 }
   0xa   :  { %p1102_p4 = pnand %p1101_p3, %p1095_p0 }
   0xc   :  { %1105 = shalt.err (!%p1102_p4)
}
   0xd   :  { %s1216_s29 = smov 64   ;;  %s1217_s30 = smov 4  }
   0xe   :  { %39 = dma.hbm_to_vmem [thread:$0]  %s1429_s1, 1536, %s34_s25, [#allocation6], %s1216_s29, %s1216_s29, %s1217_s30  }
   0xf   :  { %s1114_s10 = scalar_lea.vmem %s61_s27, 64  ;;  %p1119_p6 = scmp.lt.s32.totalorder %s61_s27, %s61_s27 }
  0x10   :  { %p1115_p5 = scmp.ne.s32.totalorder %s61_s27, %s1114_s10  ;;  %p1120_p7 = scmp.lt.s32.totalorder %s1114_s10, %s1114_s10 }
  0x12   :  { %p1121_p8 = por %p1120_p7, %p1119_p6 }
  0x14   :  { %p1122_p9 = pnand %p1121_p8, %p1115_p5 }
  0x16   :  { %1125 = shalt.err (!%p1122_p9)
}
  0x17   :  { %63 = dma.hbm_to_vmem [thread:$0]  %s1432_s4, 64, %s61_s27, [#allocation9]  }
  0x18   :  { %s1218_s13 = smov [#allocation2]   ;;  %s1219_s15 = smov [#allocation7]  }
  0x19   :  { %s21_s14 = sshll.u32 %s1218_s13, 4  ;;  %s45_s16 = sshll.u32 %s1219_s15, 4  ;;  %s22_s14 = int_to_ptr.vmem [resolvable:$true] %s21_s14  ;;  %s46_s16 = int_to_ptr.vmem [resolvable:$true] %s45_s16 }
  0x1a   :  { %s1134_s17 = scalar_lea.vmem %s22_s14, 256  ;;  %p1139_p11 = scmp.lt.s32.totalorder %s22_s14, %s22_s14 }
  0x1b   :  { %p1135_p10 = scmp.ne.s32.totalorder %s22_s14, %s1134_s17  ;;  %p1140_p12 = scmp.lt.s32.totalorder %s1134_s17, %s1134_s17 }
  0x1d   :  { %p1141_p13 = por %p1140_p12, %p1139_p11 }
  0x1f   :  { %p1142_p0 = pnand %p1141_p13, %p1135_p10 }
  0x21   :  { %1145 = shalt.err (!%p1142_p0)
}
  0x22   :  { %27 = dma.hbm_to_vmem [thread:$0]  %s1428_s0, 256, %s22_s14, [#allocation3], %s1216_s29, %s1216_s29, %s1217_s30  }
  0x23   :  { %s1154_s4 = scalar_lea.vmem %s46_s16, 3072  ;;  %p1159_p2 = scmp.lt.s32.totalorder %s46_s16, %s46_s16 }
  0x24   :  { %p1155_p1 = scmp.ne.s32.totalorder %s46_s16, %s1154_s4  ;;  %p1160_p3 = scmp.lt.s32.totalorder %s1154_s4, %s1154_s4 }
  0x26   :  { %p1161_p4 = por %p1160_p3, %p1159_p2 }
  0x28   :  { %p1162_p5 = pnand %p1161_p4, %p1155_p1 }
  0x2a   :  { %1165 = shalt.err (!%p1162_p5)
}
  0x2b   :  { %51 = dma.hbm_to_vmem [thread:$0]  %s1430_s2, 3072, %s46_s16, [#allocation6], %s1216_s29, %s1216_s29, %s1217_s30  }
  0x2c   :  { %s1220_s21 = smov [#allocation10]  }
  0x2d   :  { %s71_s22 = sshll.u32 %s1220_s21, 4  ;;  %s72_s22 = int_to_ptr.vmem [resolvable:$true] %s71_s22 }
  0x2e   :  { %s1174_s23 = scalar_lea.vmem %s72_s22, 256  ;;  %p1179_p7 = scmp.lt.s32.totalorder %s72_s22, %s72_s22 }
  0x2f   :  { %p1175_p6 = scmp.ne.s32.totalorder %s72_s22, %s1174_s23  ;;  %p1180_p8 = scmp.lt.s32.totalorder %s1174_s23, %s1174_s23 }
  0x31   :  { %p1181_p9 = por %p1180_p8, %p1179_p7 }
  0x33   :  { %p1182_p10 = pnand %p1181_p9, %p1175_p6 }
  0x35   :  { %1185 = shalt.err (!%p1182_p10)
}
  0x36   :  { %77 = dma.hbm_to_vmem [thread:$0]  %s1434_s6, 256, %s72_s22, [#allocation9], %s1216_s29, %s1216_s29, %s1217_s30  }
  0x37   :  { %1206 = dma.done.wait [#allocation3], 256  }
  0x38   :  { %1207 = vsyncadd [#allocation3], 4294967040 }
  0x39   :  { %1208 = dma.done.wait [#allocation6], 4608  }
  0x3a   :  { %1209 = vsyncadd [#allocation6], 4294962688 }
  0x3b   :  { %1210 = dma.done.wait [#allocation9], 320  }
  0x3c   :  { %1211 = vsyncadd [#allocation9], 4294966976  ;;  %v1221_v0 = vmov 0   ;;  %v1038_v1 = vld [vmem:[#allocation2] sm:$0xff]   ;;  %v1039_v2 = vld [vmem:[#allocation2 + $0x8] sm:$0xff]   ;;  %vm161_vm0 = vcmask 1047552   ;;  %v179_v37 = vlaneseq }
  0x3d   :  { %261 = vmatprep.subr.bf16.mxu0 %v1221_v0  ;;  %166 = vrot.lane.b32.xlu0 %v1038_v1, %s1216_s29  ;;  %v1040_v3 = vld [vmem:[#allocation5 + $0x38] sm:$0xff]   ;;  %v135_v4 = vshrl.u32 %v1038_v1, 16  ;;  %vm162_vm1 = vsmask.f32 7424  ;;  %v1041_v5 = vld [vmem:[#allocation5 + $0x30] sm:$0xff]   ;;  %v138_v7 = vshll.u32 %v1038_v1, 16 }
  0x3e   :  { %262 = vmatpush1.bf16.msra.mxu0 %v1040_v3  ;;  %vm1299_vm2 = vmand %vm161_vm0, %vm162_vm1  ;;  %v1042_v11 = vld [vmem:[#allocation5 + $0x28] sm:$0xff]   ;;  %vm170_vm3 = vcmask 523264   ;;  %v1043_v14 = vld [vmem:[#allocation5 + $0x20] sm:$0xff]   ;;  %v145_v23 = vshll.u32 %v1039_v2, 16  ;;  %vm150_vm4 = vcmask 1040384   ;;  %v142_v24 = vshrl.u32 %v1039_v2, 16 }
  0x3f   :  { %v137_v6 = vrot.slane %v135_v4, 7  ;;  %263 = vmatprep.subr.bf16.mxu0 %v1221_v0  ;;  %v155_v8 = vrot.slane %v138_v7, 1  ;;  %v1044_v15 = vld [vmem:[#allocation5 + $0x18] sm:$0xff]   ;;  %v1045_v16 = vld [vmem:[#allocation5 + $0x10] sm:$0xff]   ;;  %v1046_v17 = vld [vmem:[#allocation5 + $0x8] sm:$0xff]   ;;  %v1320_v38 = vshrl.u32 %v179_v37, 7 }
  0x40   :  { %v1047_v18 = vld [vmem:[#allocation5] sm:$0xff]   ;;  %v1048_v19 = vld [vmem:[#allocation5 + $0x58] sm:$0xff]   ;;  %v1049_v20 = vld [vmem:[#allocation5 + $0x50] sm:$0xff]   ;;  %vm151_vm5 = vsmask.f32 256  ;;  %v157_v25 = vrot.slane %v145_v23, 1 }
  0x41   :  { %168 = vrot.lane.b32.xlu0 %v1039_v2, %s1216_s29  ;;  %v140_v10 = vor.u32 %v138_v7, %v137_v6  ;;  %v156_v12 = vor.u32 %v155_v8, %v135_v4  ;;  %v1050_v21 = vld [vmem:[#allocation5 + $0x48] sm:$0xff]   ;;  %v1051_v22 = vld [vmem:[#allocation5 + $0x40] sm:$0xff]   ;;  %vm1307_vm6 = vmand %vm150_vm4, %vm151_vm5  ;;  %v144_v28 = vrot.slane %v142_v24, 7  ;;  %v1323_v39 = vsub.s32 0, %v1320_v38  ;;  %s1223_s25 = smov 16   ;;  %s1224_s26 = smov 32  }
  0x42   :  { %264 = vmatpush1.bf16.msra.mxu0 %v1041_v5  ;;  %v158_v27 = vor.u32 %v157_v25, %v142_v24  ;;  %v1328_v40 = vld [vmem:[%s1431_s3] sm:$0x7]  ;;  %s1222_s3 = smov 8   ;;  %v1056_v24 = vld [vmem:[#allocation7 + $0x68] sm:$0xff]   ;;  %v1068_v37 = vld [vmem:[#allocation7 + $0xb8] sm:$0xff]   ;;  %vm1226_vm7 = vmmov 0  }
  0x43   :  { %265 = vmatprep.subr.bf16.mxu0 %v1221_v0  ;;  %v164_v13 = vsel %vm1299_vm2, %v156_v12, 0  ;;  %v153_v29 = vsel %vm1307_vm6, 0, %v140_v10  ;;  %v147_v32 = vor.u32 %v145_v23, %v144_v28  ;;  %v182_v43 = vrot.slane %v1328_v40, %v1323_v39  ;;  %v1055_v23 = vld [vmem:[#allocation7 + $0x30] sm:$0xff]   ;;  %v1057_v25 = vld [vmem:[#allocation7 + $0x28] sm:$0xff]   ;;  %v1059_v28 = vld [vmem:[#allocation7 + $0x20] sm:$0xff]  }
  0x44   :  { %924 = vmatprep.mubr.msk.bf16.mxu0 %vm170_vm3, %v164_v13  ;;  %v165_v31 = vsel %vm1299_vm2, %v158_v27, 0  ;;  %v1058_v27 = vld [vmem:[#allocation7 + $0x60] sm:$0xff]   ;;  %vm806_vm8 = vcmask 261120  }
  0x45   :  { %v154_v35 = vsel %vm1307_vm6, 0, %v147_v32  ;;  %v1063_v32 = vld [vmem:[#allocation7 + $0x10] sm:$0xff]  }
  0x46   :  { %266 = vmatpush1.bf16.msra.mxu0 %v1042_v11 }
  0x47   :  { %267 = vmatprep.subr.bf16.mxu0 %v1221_v0 }
  0x4a   :  { %268 = vmatpush1.bf16.msra.mxu0 %v1043_v14 }
  0x4b   :  { %269 = vmatprep.subr.bf16.mxu0 %v1221_v0 }
  0x4e   :  { %270 = vmatpush1.bf16.msra.mxu0 %v1044_v15 }
  0x4f   :  { %271 = vmatprep.subr.bf16.mxu0 %v1221_v0 }
  0x52   :  { %272 = vmatpush1.bf16.msra.mxu0 %v1045_v16 }
  0x53   :  { %273 = vmatprep.subr.bf16.mxu0 %v1221_v0 }
  0x56   :  { %274 = vmatpush1.bf16.msra.mxu0 %v1046_v17 }
  0x57   :  { %275 = vmatprep.subr.bf16.mxu0 %v1221_v0 }
  0x5a   :  { %276 = vmatpush1.bf16.msra.mxu0 %v1047_v18 }
  0x5b   :  { %285 = vmatprep.subr.bf16.mxu0 %v1221_v0 }
  0x5e   :  { %286 = vmatpush2.bf16.msra.mxu0 %v1048_v19 }
  0x5f   :  { %287 = vmatprep.subr.bf16.mxu0 %v1221_v0 }
  0x62   :  { %288 = vmatpush2.bf16.msra.mxu0 %v1049_v20  ;;  %v1052_v20 = vld [vmem:[#allocation7 + $0x78] sm:$0xff]  }
  0x63   :  { %289 = vmatprep.subr.bf16.mxu0 %v1221_v0  ;;  %953 = vmatprep.subr.bf16.mxu1 %v1052_v20 }
  0x66   :  { %290 = vmatpush2.bf16.msra.mxu0 %v1050_v21  ;;  %v1053_v21 = vld [vmem:[#allocation7 + $0x38] sm:$0xff]  }
  0x67   :  { %291 = vmatprep.subr.bf16.mxu0 %v1221_v0  ;;  %954 = vmatpush3.bf16.msra.mxu1 %v1053_v21  ;;  %v1071_v21 = vld [vmem:[#allocation7 + $0xa0] sm:$0xff]  }
  0x6a   :  { %292 = vmatpush2.bf16.msra.mxu0 %v1051_v22  ;;  %v1054_v22 = vld [vmem:[#allocation7 + $0x70] sm:$0xff]  }
  0x6b   :  { %955 = vmatprep.subr.bf16.mxu1 %v1054_v22 }
  0x6c   :  { %956 = vmatpush3.bf16.msra.mxu1 %v1055_v23 }
  0x6d   :  { %957 = vmatprep.subr.bf16.mxu1 %v1056_v24  ;;  %v1072_v24 = vld [vmem:[#allocation7 + $0x98] sm:$0xff]  }
  0x70   :  { %958 = vmatpush3.bf16.msra.mxu1 %v1057_v25  ;;  %v1073_v25 = vld [vmem:[#allocation7 + $0x90] sm:$0xff]  }
  0x71   :  { %959 = vmatprep.subr.bf16.mxu1 %v1058_v27  ;;  %v1074_v27 = vld [vmem:[#allocation7 + $0x88] sm:$0xff]  }
  0x74   :  { %960 = vmatpush3.bf16.msra.mxu1 %v1059_v28  ;;  %v1075_v28 = vld [vmem:[#allocation7 + $0x80] sm:$0xff]  }
  0xaf   :  { %v167_v30 = vpop.permute.xlu0 %166 }
  0xb0   :  { %v173_v33 = vsel %vm170_vm3, %v153_v29, %v167_v30  ;;  %v1060_v29 = vld [vmem:[#allocation7 + $0x58] sm:$0xff]  }
  0xb1   :  { %294 = vmatmul.mubr.bf16.vlgmr.msra.gmra.mxu0 %v173_v33  ;;  %v1061_v30 = vld [vmem:[#allocation7 + $0x18] sm:$0xff]   ;;  %961 = vmatprep.subr.bf16.mxu1 %v1060_v29  ;;  %v1064_v33 = vld [vmem:[#allocation7 + $0x48] sm:$0xff]  }
  0xb2   :  { %925 = vmatprep.mubr.msk.bf16.mxu0 %vm170_vm3, %v165_v31  ;;  %962 = vmatpush3.bf16.msra.mxu1 %v1061_v30  ;;  %v1062_v31 = vld [vmem:[#allocation7 + $0x50] sm:$0xff]  }
  0xb3   :  { %v169_v34 = vpop.permute.xlu0 %168  ;;  %963 = vmatprep.subr.bf16.mxu1 %v1062_v31 }
  0xb4   :  { %v177_v36 = vsel %vm170_vm3, %v154_v35, %v169_v34  ;;  %v1065_v34 = vld [vmem:[#allocation7 + $0x8] sm:$0xff]   ;;  %v1066_v35 = vld [vmem:[#allocation7 + $0x40] sm:$0xff]  }
  0xb6   :  { %964 = vmatpush3.bf16.msra.mxu1 %v1063_v32 }
  0xb7   :  { %965 = vmatprep.subr.bf16.mxu1 %v1064_v33 }
  0xb9   :  { %302 = vmatmul.mubr.bf16.gmra.mxu0 %v177_v36  ;;  %v1067_v36 = vld [vmem:[#allocation7] sm:$0xff]  }
  0xba   :  { %966 = vmatpush3.bf16.msra.mxu1 %v1065_v34 }
  0xbb   :  { %967 = vmatprep.subr.bf16.mxu1 %v1066_v35 }
  0xbe   :  { %968 = vmatpush3.bf16.msra.mxu1 %v1067_v36 }
  0xbf   :  { %994 = vmatprep.subr.bf16.mxu1 %v1068_v37 }
 0x171   :  { %v295_v41 = vpop.f32.mrf.mxu0 }
 0x172   :  { %v1334_v47 = vadd.f32 %v295_v41, %v182_v43 }
 0x173   :  { %v297_v42 = vpop.f32.mrf.mxu0 }
 0x174   :  { %v319_v52 = vmul.f32 %v1334_v47, %v1334_v47 }
 0x175   :  { %v298_v44 = vpop.f32.mrf.mxu0 }
 0x176   :  { %v1332_v45 = vadd.f32 %v298_v44, %v182_v43 }
 0x177   :  { %v300_v46 = vpop.f32.mrf.mxu0 }
 0x178   :  { %v320_v49 = vmul.f32 %v1332_v45, %v1332_v45  ;;  %v310_v53 = vadd.f32 %v1332_v45, %v1334_v47 }
 0x179   :  { %v303_v48 = vpop.f32.mrf.mxu0 }
 0x17a   :  { %v1338_v50 = vadd.f32 %v303_v48, %v182_v43  ;;  %v323_v56 = vadd.f32 %v320_v49, %v319_v52 }
 0x17b   :  { %v305_v51 = vpop.f32.mrf.mxu0 }
 0x17c   :  { %v321_v54 = vmul.f32 %v1338_v50, %v1338_v50  ;;  %v311_v57 = vadd.f32 %v310_v53, %v1338_v50  ;;  %v365_v53 = vsub.s32 1, %v1320_v38 }
 0x17d   :  { %v306_v55 = vpop.f32.mrf.mxu0 }
 0x17e   :  { %v1347_v58 = vadd.f32 %v306_v55, %v182_v43  ;;  %v324_v60 = vadd.f32 %v323_v56, %v321_v54 }
 0x17f   :  { %v308_v59 = vpop.f32.mrf.mxu0 }
 0x180   :  { %v312_v61 = vadd.f32 %v311_v57, %v1347_v58  ;;  %v322_v62 = vmul.f32 %v1347_v58, %v1347_v58  ;;  %v373_v57 = vsub.s32 2, %v1320_v38 }
 0x182   :  { %v313_v63 = vrot.slane %v312_v61, 4  ;;  %v325_v0 = vadd.f32 %v324_v60, %v322_v62 }
 0x184   :  { %v314_v1 = vadd.f32 %v313_v63, %v312_v61  ;;  %v326_v2 = vrot.slane %v325_v0, 4 }
 0x186   :  { %v315_v3 = vrot.slane %v314_v1, 2  ;;  %v327_v4 = vadd.f32 %v326_v2, %v325_v0 }
 0x188   :  { %v316_v5 = vadd.f32 %v315_v3, %v314_v1  ;;  %v328_v6 = vrot.slane %v327_v4, 2 }
 0x18a   :  { %v317_v7 = vrot.slane %v316_v5, 1  ;;  %v329_v8 = vadd.f32 %v328_v6, %v327_v4 }
 0x18c   :  { %v330_v10 = vrot.slane %v329_v8, 1  ;;  %v318_v11 = vadd.f32 %v317_v7, %v316_v5 }
 0x18e   :  { %v331_v12 = vadd.f32 %v330_v10, %v329_v8 }
 0x190   :  { %v333_v13 = vsel %vm150_vm4, %v318_v11, %v331_v12 }
 0x191   :  { %334 = vrot.lane.b32.xlu1 %v333_v13, %s1222_s3 }
 0x203   :  { %v335_v14 = vpop.permute.xlu1 %334 }
 0x204   :  { %v336_v15 = vadd.f32 %v335_v14, %v333_v13 }
 0x206   :  { %337 = vrot.lane.b32.xlu1 %v336_v15, %s1223_s25 }
 0x278   :  { %v338_v16 = vpop.permute.xlu1 %337 }
 0x279   :  { %v339_v17 = vadd.f32 %v338_v16, %v336_v15  ;;  %v1069_v15 = vld [vmem:[#allocation7 + $0xb0] sm:$0xff]  }
 0x27b   :  { %340 = vrot.lane.b32.xlu0 %v339_v17, %s1224_s26 }
 0x2ed   :  { %v341_v18 = vpop.permute.xlu0 %340 }
 0x2ee   :  { %v342_v19 = vadd.f32 %v341_v18, %v339_v17  ;;  %v1070_v18 = vld [vmem:[#allocation7 + $0xa8] sm:$0xff]  }
 0x2f0   :  { %343 = vrot.lane.b32.xlu1 %v342_v19, %s1216_s29 }
 0x362   :  { %v344_v41 = vpop.permute.xlu1 %343 }
 0x363   :  { %v345_v42 = vadd.f32 %v344_v41, %v342_v19  ;;  %v1377_v41 = vld [vmem:[#allocation8] sm:$0xf] }
 0x365   :  { %v346_v43 = vmul.f32 0.001953125, %v345_v42 }
 0x367   :  { %v347_v44 = vmul.f32 %v346_v43, %v346_v43 }
 0x369   :  { %v349_v46 = vrot.slane %v347_v44, 7  ;;  %v462_v44 = vrot.slane %v1377_v41, %v1323_v39 }
 0x36b   :  { %v351_v48 = vsub.f32 %v346_v43, %v349_v46 }
 0x36d   :  { %v352_v49 = vadd.f32 1e-05, %v351_v48 }
 0x36f   :  { %1078 = vrsqrt.f32 %v352_v49 }
 0x37c   :  { %v1079_v51 = vpop.eup %1078 }
 0x37d   :  { %v354_v52 = vmul.f32 %v1079_v51, %v1328_v40 }
 0x37f   :  { %v356_v54 = vrot.slane %v354_v52, 1  ;;  %v366_v56 = vrot.slane %v354_v52, %v365_v53 }
 0x381   :  { %v358_v55 = vmul.f32 %v356_v54, %v346_v43  ;;  %v367_v61 = vmul.f32 %v366_v56, %v1334_v47  ;;  %v368_v63 = vmul.f32 %v366_v56, %v1332_v45  ;;  %v369_v0 = vmul.f32 %v366_v56, %v1338_v50 }
 0x382   :  { %v370_v1 = vmul.f32 %v366_v56, %v1347_v58 }
 0x383   :  { %v360_v59 = vrot.slane %v358_v55, 6 }
 0x385   :  { %v362_v60 = vsub.f32 %v1328_v40, %v360_v59 }
 0x387   :  { %v374_v62 = vrot.slane %v362_v60, %v373_v57 }
 0x389   :  { %v375_v2 = vadd.f32 %v374_v62, %v367_v61  ;;  %v376_v3 = vadd.f32 %v374_v62, %v368_v63  ;;  %v377_v4 = vadd.f32 %v374_v62, %v369_v0  ;;  %v378_v5 = vadd.f32 %v374_v62, %v370_v1 }
 0x38b   :  { %v379_v6 = vmax.f32 %v375_v2, 0.0  ;;  %v380_v7 = vmax.f32 %v376_v3, 0.0  ;;  %v381_v8 = vmax.f32 %v377_v4, 0.0  ;;  %v382_v10 = vmax.f32 %v378_v5, 0.0 }
 0x38d   :  { %v383_v40 = vpack.c.bf16 %v380_v7, %v379_v6  ;;  %v384_v11 = vpack.c.bf16 %v382_v10, %v381_v8 }
 0x38f   :  { %639 = vmatprep.mubr.bf16.mxu1 %v383_v40  ;;  %v434_v47 = vshrl.u32 %v383_v40, 16  ;;  %v437_v13 = vshll.u32 %v383_v40, 16  ;;  %v441_v14 = vshrl.u32 %v384_v11, 16  ;;  %v444_v17 = vshll.u32 %v384_v11, 16 }
 0x391   :  { %v436_v12 = vrot.slane %v434_v47, 7  ;;  %v443_v58 = vrot.slane %v441_v14, 7  ;;  %v451_v16 = vrot.slane %v437_v13, 1  ;;  %v453_v29 = vrot.slane %v444_v17, 1 }
 0x393   :  { %v439_v45 = vor.u32 %v437_v13, %v436_v12  ;;  %v446_v19 = vor.u32 %v444_v17, %v443_v58  ;;  %v452_v20 = vor.u32 %v451_v16, %v434_v47  ;;  %v454_v26 = vor.u32 %v453_v29, %v441_v14 }
 0x395   :  { %v449_v50 = vsel %vm1307_vm6, 0, %v439_v45  ;;  %v450_v22 = vsel %vm1307_vm6, 0, %v446_v19  ;;  %v457_v23 = vsel %vm1299_vm2, %v452_v20, 0  ;;  %v458_v30 = vsel %vm1299_vm2, %v454_v26, 0  ;;  %v1076_v20 = vld [vmem:[#allocation10 + $0x8] sm:$0xff]  }
 0x396   :  { %640 = vmatmul.mubr.bf16.vlgmr.msra.gmra.mxu1 %v449_v50 }
 0x397   :  { %995 = vmatpush3.bf16.msra.mxu1 %v1068_v37  ;;  %647 = vmatprep.mubr.bf16.mxu1 %v384_v11 }
 0x398   :  { %996 = vmatprep.subr.bf16.mxu1 %v1069_v15 }
 0x39b   :  { %997 = vmatpush3.bf16.msra.mxu1 %v1069_v15 }
 0x39c   :  { %998 = vmatprep.subr.bf16.mxu1 %v1070_v18 }
 0x39e   :  { %648 = vmatmul.mubr.bf16.gmra.mxu1 %v450_v22  ;;  %v1225_v22 = vmov 0.0  }
 0x39f   :  { %999 = vmatpush3.bf16.msra.mxu1 %v1070_v18  ;;  %1010 = vmatprep.mubr.bf16.mxu1 %v457_v23 }
 0x3a0   :  { %1000 = vmatprep.subr.bf16.mxu1 %v1071_v21  ;;  %1014 = vmatprep.subr.bf16.mxu0 %v1225_v22 }
 0x3a1   :  { %1018 = vmatprep.mubr.msk.bf16.mxu0 %vm1226_vm7, %v1225_v22  ;;  %1015 = vmatpush3.bf16.msra.mxu0 %v1076_v20 }
 0x3a2   :  { %1016 = vmatprep.subr.bf16.mxu0 %v1225_v22 }
 0x3a3   :  { %1001 = vmatpush3.bf16.msra.mxu1 %v1071_v21  ;;  %v777_v21 = vld [vmem:[%s1433_s5] sm:$0x3]  ;;  %s1228_s5 = smov [#allocation11]  }
 0x3a4   :  { %1002 = vmatprep.subr.bf16.mxu1 %v1072_v24  ;;  %v778_v23 = vsub.f32 0.0, %v777_v21 }
 0x3a7   :  { %1003 = vmatpush3.bf16.msra.mxu1 %v1072_v24  ;;  %v1077_v24 = vld [vmem:[#allocation10] sm:$0xff]  }
 0x3a8   :  { %1004 = vmatprep.subr.bf16.mxu1 %v1073_v25  ;;  %1017 = vmatpush3.bf16.msra.mxu0 %v1077_v24 }
 0x3ab   :  { %1005 = vmatpush3.bf16.msra.mxu1 %v1073_v25  ;;  %v779_v25 = vmul.f32 1.442695, %v778_v23 }
 0x3ac   :  { %1006 = vmatprep.subr.bf16.mxu1 %v1074_v27 }
 0x3ad   :  { %1080 = vpow2.f32 %v779_v25 }
 0x3af   :  { %1007 = vmatpush3.bf16.msra.mxu1 %v1074_v27 }
 0x3b0   :  { %1008 = vmatprep.subr.bf16.mxu1 %v1075_v28 }
 0x3b3   :  { %1009 = vmatpush3.bf16.msra.mxu1 %v1075_v28 }
 0x3b6   :  { %1011 = vmatmul.mubr.bf16.vlgmr.msra.gmra.mxu1 %v458_v30 }
 0x3ba   :  { %v1081_v29 = vpop.eup %1080 }
 0x3bb   :  { %v781_v26 = vadd.f32 1.0, %v1081_v29 }
 0x3bd   :  { %1082 = vrcp.f32 %v781_v26 }
 0x3ca   :  { %v1083_v30 = vpop.eup %1082 }
 0x456   :  { %v969_v31 = vpop.f32.mrf.mxu1 }
 0x458   :  { %v970_v32 = vpop.f32.mrf.mxu1 }
 0x459   :  { %v971_v43 = vadd.f32 %v970_v32, %v969_v31  ;;  %v784_v31 = vmul.f32 %v1083_v30, %v777_v21 }
 0x45a   :  { %v972_v33 = vpop.f32.mrf.mxu1 }
 0x45b   :  { %v642_v52 = vadd.f32 %v971_v43, %v462_v44  ;;  %v785_v32 = vpack.c.bf16 %v784_v31, %v784_v31 }
 0x45c   :  { %v973_v34 = vpop.f32.mrf.mxu1 }
 0x45d   :  { %v974_v48 = vadd.f32 %v973_v34, %v972_v33  ;;  %1019 = vmatmul.mubr.msk.bf16.vlgmr.msra.gmra.mxu0 %vm806_vm8, %v785_v32 }
 0x45e   :  { %v975_v35 = vpop.f32.mrf.mxu1 }
 0x45f   :  { %v645_v59 = vadd.f32 %v974_v48, %v462_v44 }
 0x460   :  { %v976_v36 = vpop.f32.mrf.mxu1 }
 0x461   :  { %v977_v49 = vadd.f32 %v976_v36, %v975_v35 }
 0x462   :  { %v978_v37 = vpop.f32.mrf.mxu1 }
 0x463   :  { %v650_v55 = vadd.f32 %v977_v49, %v462_v44 }
 0x464   :  { %v979_v42 = vpop.f32.mrf.mxu1 }
 0x465   :  { %v980_v51 = vadd.f32 %v979_v42, %v978_v37 }
 0x467   :  { %v653_v62 = vadd.f32 %v980_v51, %v462_v44 }
 0x476   :  { %v1012_v46 = vpop.f32.mrf.mxu1 }
 0x477   :  { %v1383_v61 = vadd.f32 %v1012_v46, %v650_v55  ;;  %v792_v55 = vsub.s32 3, %v1320_v38 }
 0x478   :  { %v690_v9 = vpop.f32.mrf.mxu1 }
 0x479   :  { %v1381_v56 = vadd.f32 %v690_v9, %v642_v52  ;;  %v716_v4 = vmul.f32 %v1383_v61, %v1383_v61 }
 0x47a   :  { %v1013_v54 = vpop.f32.mrf.mxu1 }
 0x47b   :  { %v714_v0 = vmul.f32 %v1381_v56, %v1381_v56  ;;  %v1389_v1 = vadd.f32 %v1013_v54, %v653_v62  ;;  %v793_v62 = vrot.slane %v1377_v41, %v792_v55 }
 0x47c   :  { %v693_v60 = vpop.f32.mrf.mxu1 }
 0x47d   :  { %v1385_v63 = vadd.f32 %v693_v60, %v645_v59  ;;  %v717_v7 = vmul.f32 %v1389_v1, %v1389_v1  ;;  %v1227_v59 = vmov 1966171168  }
 0x47e   :  { %v852_v60 = vunpack.c.l.s4 %v1227_v59 }
 0x47f   :  { %v705_v2 = vadd.f32 %v1385_v63, %v1381_v56  ;;  %v715_v3 = vmul.f32 %v1385_v63, %v1385_v63 }
 0x481   :  { %v706_v5 = vadd.f32 %v705_v2, %v1383_v61  ;;  %v718_v6 = vadd.f32 %v715_v3, %v714_v0  ;;  %v853_v0 = vunpack.c.0.s8 %v852_v60 }
 0x483   :  { %v707_v8 = vadd.f32 %v706_v5, %v1389_v1  ;;  %v719_v10 = vadd.f32 %v718_v6, %v716_v4  ;;  %v856_v3 = vsub.s32 %v853_v0, %v1320_v38 }
 0x485   :  { %v708_v40 = vrot.slane %v707_v8, 4  ;;  %v720_v11 = vadd.f32 %v719_v10, %v717_v7 }
 0x487   :  { %v709_v47 = vadd.f32 %v708_v40, %v707_v8  ;;  %v721_v12 = vrot.slane %v720_v11, 4 }
 0x489   :  { %v710_v13 = vrot.slane %v709_v47, 2  ;;  %v722_v14 = vadd.f32 %v721_v12, %v720_v11 }
 0x48b   :  { %v711_v45 = vadd.f32 %v710_v13, %v709_v47  ;;  %v723_v15 = vrot.slane %v722_v14, 2 }
 0x48d   :  { %v712_v50 = vrot.slane %v711_v45, 1  ;;  %v724_v58 = vadd.f32 %v723_v15, %v722_v14 }
 0x48f   :  { %v725_v16 = vrot.slane %v724_v58, 1  ;;  %v713_v17 = vadd.f32 %v712_v50, %v711_v45 }
 0x491   :  { %v726_v18 = vadd.f32 %v725_v16, %v724_v58 }
 0x493   :  { %v727_v19 = vsel %vm150_vm4, %v713_v17, %v726_v18 }
 0x494   :  { %728 = vrot.lane.b32.xlu0 %v727_v19, %s1222_s3 }
 0x506   :  { %v729_v27 = vpop.permute.xlu0 %728 }
 0x507   :  { %v730_v28 = vadd.f32 %v729_v27, %v727_v19 }
 0x509   :  { %731 = vrot.lane.b32.xlu1 %v730_v28, %s1223_s25 }
 0x51d   :  { %v844_v37 = vpop.f32.mrf.mxu0 }
 0x51e   :  { %v845_v2 = vadd.f32 %v844_v37, %v793_v62 }
 0x51f   :  { %v1020_v42 = vpop.f32.mrf.mxu0 }
 0x520   :  { %v857_v5 = vrot.slane %v845_v2, %v856_v3 }
 0x521   :  { %v847_v43 = vpop.f32.mrf.mxu0 }
 0x522   :  { %v858_v8 = vcombine.high %v857_v5, %v857_v5  ;;  %v865_v14 = vrot.slane %v857_v5, %v856_v3 }
 0x523   :  { %v1021_v44 = vpop.f32.mrf.mxu0 }
 0x524   :  { %v872_v47 = vrot.slane %v858_v8, %v856_v3 }
 0x526   :  { %v880_v16 = vrot.slane %v872_v47, %v1323_v39 }
 0x57b   :  { %v732_v33 = vpop.permute.xlu1 %731 }
 0x57c   :  { %v733_v34 = vadd.f32 %v732_v33, %v730_v28 }
 0x57e   :  { %734 = vrot.lane.b32.xlu0 %v733_v34, %s1224_s26 }
 0x5f0   :  { %v735_v35 = vpop.permute.xlu0 %734 }
 0x5f1   :  { %v736_v36 = vadd.f32 %v735_v35, %v733_v34 }
 0x5f3   :  { %737 = vrot.lane.b32.xlu1 %v736_v36, %s1216_s29  ;;  %s896_s29 = sshll.u32 %s1228_s5, 4  ;;  %s897_s29 = int_to_ptr.vmem [resolvable:$true] %s896_s29 }
 0x5f4   :  { %s1186_s30 = scalar_lea.vmem %s897_s29, 512  ;;  %p1191_p12 = scmp.lt.s32.totalorder %s897_s29, %s897_s29 }
 0x5f5   :  { %p1187_p11 = scmp.ne.s32.totalorder %s897_s29, %s1186_s30  ;;  %p1192_p13 = scmp.lt.s32.totalorder %s1186_s30, %s1186_s30 }
 0x5f7   :  { %p1193_p0 = por %p1192_p13, %p1191_p12 }
 0x5f9   :  { %p1194_p1 = pnand %p1193_p0, %p1187_p11 }
 0x665   :  { %v738_v46 = vpop.permute.xlu1 %737 }
 0x666   :  { %v739_v48 = vadd.f32 %v738_v46, %v736_v36 }
 0x668   :  { %v740_v49 = vmul.f32 0.001953125, %v739_v48 }
 0x66a   :  { %v741_v9 = vmul.f32 %v740_v49, %v740_v49 }
 0x66c   :  { %v743_v51 = vrot.slane %v741_v9, 7 }
 0x66e   :  { %v745_v52 = vsub.f32 %v740_v49, %v743_v51 }
 0x670   :  { %v746_v54 = vadd.f32 1e-05, %v745_v52 }
 0x672   :  { %1084 = vrsqrt.f32 %v746_v54 }
 0x67f   :  { %v1085_v4 = vpop.eup %1084 }
 0x680   :  { %v748_v6 = vmul.f32 %v1085_v4, %v1377_v41 }
 0x682   :  { %v750_v7 = vrot.slane %v748_v6, 1  ;;  %v760_v40 = vrot.slane %v748_v6, %v365_v53 }
 0x684   :  { %v752_v10 = vmul.f32 %v750_v7, %v740_v49  ;;  %v761_v13 = vmul.f32 %v760_v40, %v1381_v56  ;;  %v762_v15 = vmul.f32 %v760_v40, %v1385_v63  ;;  %v763_v50 = vmul.f32 %v760_v40, %v1383_v61 }
 0x685   :  { %v764_v58 = vmul.f32 %v760_v40, %v1389_v1 }
 0x686   :  { %v754_v11 = vrot.slane %v752_v10, 6 }
 0x688   :  { %v756_v12 = vsub.f32 %v1377_v41, %v754_v11  ;;  %v876_v41 = vrot.slane %v865_v14, %v1323_v39 }
 0x68a   :  { %v768_v45 = vrot.slane %v756_v12, %v373_v57 }
 0x68c   :  { %v769_v17 = vadd.f32 %v768_v45, %v761_v13  ;;  %v770_v53 = vadd.f32 %v768_v45, %v762_v15  ;;  %v771_v18 = vadd.f32 %v768_v45, %v763_v50  ;;  %v772_v19 = vadd.f32 %v768_v45, %v764_v58 }
 0x68e   :  { %v773_v56 = vmax.f32 %v769_v17, 0.0  ;;  %v774_v20 = vmax.f32 %v770_v53, 0.0  ;;  %v775_v38 = vmax.f32 %v771_v18, 0.0  ;;  %v776_v57 = vmax.f32 %v772_v19, 0.0 }
 0x690   :  { %v883_v21 = vadd.f32 %v876_v41, %v773_v56  ;;  %v884_v63 = vadd.f32 %v876_v41, %v774_v20  ;;  %v885_v22 = vadd.f32 %v880_v16, %v775_v38  ;;  %v886_v61 = vadd.f32 %v880_v16, %v776_v57 }
 0x692   :  { %887 = vst [vmem:[#allocation11] sm:$0xff] %v883_v21  ;;  %888 = vst [vmem:[#allocation11 + $0x8] sm:$0xff] %v884_v63 }
 0x693   :  { %889 = vst [vmem:[#allocation11 + $0x10] sm:$0xff] %v885_v22  ;;  %890 = vst [vmem:[#allocation11 + $0x18] sm:$0xff] %v886_v61 }
 0x694   :  { %1197 = shalt.err (!%p1194_p1)
}
 0x695   :  { %s1229_s8 = smov 128  }
 0x696   :  { %902 = dma.vmem_to_hbm [thread:$0]  %s897_s29, 512, %s1435_s7, [#allocation4], %s1229_s8, %s1229_s8, %s1222_s3  }
 0x697   :  { %1212 = dma.done.wait [#allocation4], 512  }
 0x698   :  { %1213 = vsyncadd [#allocation4], 4294966784 }
 0x699   :  { %906 = vsyncpa [#allocation3], 1 }
 0x69a   :  { %907 = vsyncpa [#allocation6], 1 }
 0x69b   :  { %908 = vsyncpa [#allocation9], 1 }
 0x69c   :  { %909 = vsyncpa [#allocation4], 1 }

</bundles_post_ra>
